<compile_context>
chip_gen: v6e
topology: v6e:2x2x1
jax: 0.10.0
libtpu: 0.0.40
codegen_flags: <defaults>
</compile_context>

<pallas_src>
import jax
import jax.numpy as jnp
from jax.experimental import pallas as pl
from jax.experimental.pallas import tpu as pltpu


def seq_attn_pool_kernel(x_ref, w1_ref, b1_ref, w2_ref, out_ref):
    # x_ref:  (TB, L, D)   TB batch rows per grid step
    # w1_ref: (D, H), b1_ref: (1, H)
    # w2_ref: (1, H)       linear2 weight as a row (output size is 1)
    # out_ref: (TB, D)
    tb, L, D = x_ref.shape
    x = x_ref[...]                                             # (TB, L, D)

    # ---- FFN layer 1 on the MXU with a dense M dimension (TB*L rows) ----
    # Note: the collapse is layout-preserving when L % 8 == 0 (sublane merge);
    # other L values still work but may incur an in-kernel relayout.
    x2 = x.reshape(tb * L, D)
    h = jnp.dot(x2, w1_ref[...],
                preferred_element_type=jnp.float32,
                precision=jax.lax.Precision.HIGHEST)
    h = jnp.maximum(h + b1_ref[...], 0.0)                      # (TB*L, H)

    # ---- FFN layer 2: H -> 1 as VPU mul + lane reduce (no N=1 matmul) ----
    # b2 is omitted: softmax(s + c) == softmax(s) (shift invariance).
    h3 = h.reshape(tb, L, h.shape[-1])                         # (TB, L, H)
    s = jnp.sum(h3 * w2_ref[...], axis=-1)                     # (TB, L) lane-dense

    # ---- softmax over the sequence axis, normalization deferred ----
    m = jnp.max(s, axis=-1, keepdims=True)                     # (TB, 1)
    e = jnp.exp(s - m)                                         # (TB, L)
    denom = jnp.sum(e, axis=-1, keepdims=True)                 # (TB, 1)

    # ---- weighted sum over the sequence, then one exact divide ----
    unnorm = jnp.sum(x * e[:, :, None], axis=1)                # (TB, D)
    out_ref[...] = (unnorm / denom).astype(out_ref.dtype)


def _round_up(n, m):
    return ((n + m - 1) // m) * m


def _tensorcores_per_chip():
    # Generation-aware grid splitting: only v7x has 2 TensorCores per chip.
    try:
        kind = jax.devices()[0].device_kind.lower()
        return 2 if "v7" in kind else 1
    except Exception:
        return 1


def _choose_batch_tile(B, L, D, num_cores, itemsize=4):
    # Lane/sublane-padded VMEM footprint of one batch row of the x block
    # (D=32 pads to 128 lanes -> ~4x the raw bytes).
    row_bytes = _round_up(L, 8) * max(_round_up(D, 128), 128) * itemsize
    # Budget ~8 MiB for the double-buffered x block; intermediates (h, e*x,
    # out) add a comparable amount, all comfortably inside the 32 MiB scoped
    # VMEM limit we request (and well under v5e's 16 MiB default would be too).
    cap = max(8, min(512, (8 * 1024 * 1024) // (2 * row_bytes)))
    if num_cores > 1:
        # v7x: keep >= num_cores grid steps so both TensorCores get work, by
        # bounding the tile — never by shrinking it to manufacture steps.
        cap = min(cap, max(8, pl.cdiv(B, num_cores)))
    if B <= cap:
        return B          # single grid step covers the whole batch
    # Multi-step: keep the (tb, D) output block sublane-aligned (tb % 8 == 0).
    return _round_up(min(cap, B), 8)


def seq_attn_pooling(x, w1, b1, w2, b2=None, *, tb=None):
    """x: (B, L, D); w1: (D, H); b1: (1, H); w2: (H, 1); b2 unused.

    b2 is accepted for interface parity with the PyTorch module but not passed
    to the kernel: adding a scalar to all scores is a no-op under softmax.
    """
    del b2
    B, L, D = x.shape
    H = w1.shape[1]
    num_cores = _tensorcores_per_chip()
    if tb is None:
        tb = _choose_batch_tile(B, L, D, num_cores)

    # Pad the batch up to a tile multiple instead of falling back to tiny
    # tiles for awkward B; padded rows produce finite garbage we discard.
    B_pad = pl.cdiv(B, tb) * tb
    if B_pad != B:
        x = jnp.pad(x, ((0, B_pad - B), (0, 0), (0, 0)))

    w2_row = w2.reshape(1, H)

    out = pl.pallas_call(
        seq_attn_pool_kernel,
        out_shape=jax.ShapeDtypeStruct((B_pad, D), x.dtype),
        grid=(B_pad // tb,),
        in_specs=[
            pl.BlockSpec((tb, L, D), lambda b: (b, 0, 0)),
            pl.BlockSpec((D, H), lambda b: (0, 0)),
            pl.BlockSpec((1, H), lambda b: (0, 0)),
            pl.BlockSpec((1, H), lambda b: (0, 0)),
        ],
        out_specs=pl.BlockSpec((tb, D), lambda b: (b, 0)),
        compiler_params=pltpu.CompilerParams(
            dimension_semantics=("parallel",),
            vmem_limit_bytes=32 * 1024 * 1024),
    )(x, w1, b1, w2_row)
    return out[:B]


def reference(x, w1, b1, w2, b2):
    hp = jax.lax.Precision.HIGHEST
    h = jnp.maximum(jnp.einsum("bld,dh->blh", x, w1, precision=hp) + b1, 0.0)
    s = (jnp.einsum("blh,ho->blo", h, w2, precision=hp) + b2[0, 0])[..., 0]
    alpha = jax.nn.softmax(s, axis=-1)
    return jnp.einsum("bl,bld->bd", alpha, x, precision=hp)


def _run_case(key, B, L, D, H, tb=None):
    kx, k1, k2, k3, k4 = jax.random.split(key, 5)
    x  = jax.random.normal(kx, (B, L, D), dtype=jnp.float32)
    w1 = jax.random.normal(k1, (D, H), dtype=jnp.float32) * 0.1   # linear1.weight.T
    b1 = jax.random.normal(k2, (1, H), dtype=jnp.float32) * 0.1   # linear1.bias
    w2 = jax.random.normal(k3, (H, 1), dtype=jnp.float32) * 0.1   # linear2.weight.T
    b2 = jax.random.normal(k4, (1, 1), dtype=jnp.float32) * 0.1   # linear2.bias

    out = jax.block_until_ready(seq_attn_pooling(x, w1, b1, w2, b2, tb=tb))
    ref = reference(x, w1, b1, w2, b2)
    assert out.shape == (B, D)
    err = jnp.max(jnp.abs(out - ref))
    assert jnp.allclose(out, ref, atol=1e-3, rtol=1e-3), f"mismatch vs reference (max abs err {err})"


if __name__ == "__main__":
    # Shapes consistent with the module: input_size (dim)=32, hidden_size=128.
    key = jax.random.PRNGKey(0)
    k_small, k_batched, k_pad = jax.random.split(key, 3)
    # Small case (B=2, L=8): single grid step on 1-TC chips.
    _run_case(k_small, B=2, L=8, D=32, H=128)
    # Larger batch exercising the batched (TB*L, D) matmul path in one step.
    _run_case(k_batched, B=16, L=8, D=32, H=128)
    # Forced-small tile exercising the multi-step grid + batch-padding path
    # (B=10, tb=8 -> padded to 16, grid=2, padded rows discarded).
    _run_case(k_pad, B=10, L=8, D=32, H=128, tb=8)

    print("KERNEL_OK")
</pallas_src>

<mosaic_0001>
module attributes {stable_mosaic.version = 11 : i64} {
  func.func @seq_attn_pool_kernel(%arg0: i32, %arg1: memref<2x8x32xf32, #tpu.memory_space<vmem>>, %arg2: memref<32x128xf32, #tpu.memory_space<vmem>>, %arg3: memref<1x128xf32, #tpu.memory_space<vmem>>, %arg4: memref<1x128xf32, #tpu.memory_space<vmem>>, %arg5: memref<2x32xf32, #tpu.memory_space<vmem>>) attributes {dimension_semantics = [#tpu.dimension_semantics<parallel>], iteration_bounds = array<i64: 1>, scalar_prefetch = 0 : i64, scratch_operands = 0 : i64, tpu.core_type = #tpu.core_type<tc>, window_params = [{transform_indices = @transform_0, window_bounds = array<i64: 2, 8, 32>}, {pipeline_mode = #tpu.pipeline_mode<synchronous>, transform_indices = @transform_1, window_bounds = array<i64: 32, 128>}, {pipeline_mode = #tpu.pipeline_mode<synchronous>, transform_indices = @transform_2, window_bounds = array<i64: 1, 128>}, {pipeline_mode = #tpu.pipeline_mode<synchronous>, transform_indices = @transform_3, window_bounds = array<i64: 1, 128>}, {transform_indices = @transform_4, window_bounds = array<i64: 2, 32>}]} {
    %c0 = arith.constant 0 : index
    %c0_0 = arith.constant 0 : index
    %c0_1 = arith.constant 0 : index
    %0 = vector.load %arg1[%c0, %c0_0, %c0_1] : memref<2x8x32xf32, #tpu.memory_space<vmem>>, vector<2x8x32xf32>
    %1 = vector.shape_cast %0 : vector<2x8x32xf32> to vector<16x32xf32>
    %c0_2 = arith.constant 0 : index
    %c0_3 = arith.constant 0 : index
    %2 = vector.load %arg2[%c0_2, %c0_3] : memref<32x128xf32, #tpu.memory_space<vmem>>, vector<32x128xf32>
    %cst = arith.constant dense<0.000000e+00> : vector<16x128xf32>
    %3 = tpu.matmul %1, %2, %cst {dimension_numbers = #tpu.dot_dimension_numbers<[1], [0], [0], [1], [0, 0, 1, 1], [], []>, precision = #tpu.contract_precision<fp32>} : vector<16x32xf32>, vector<32x128xf32>, vector<16x128xf32> -> vector<16x128xf32>
    %c0_4 = arith.constant 0 : index
    %c0_5 = arith.constant 0 : index
    %4 = vector.load %arg3[%c0_4, %c0_5] : memref<1x128xf32, #tpu.memory_space<vmem>>, vector<1x128xf32>
    %5 = vector.broadcast %4 : vector<1x128xf32> to vector<16x128xf32>
    %6 = arith.addf %3, %5 : vector<16x128xf32>
    %cst_6 = arith.constant 0.000000e+00 : f32
    %7 = vector.broadcast %cst_6 : f32 to vector<16x128xf32>
    %8 = arith.maximumf %6, %7 : vector<16x128xf32>
    %9 = vector.shape_cast %8 : vector<16x128xf32> to vector<2x8x128xf32>
    %c0_7 = arith.constant 0 : index
    %c0_8 = arith.constant 0 : index
    %10 = vector.load %arg4[%c0_7, %c0_8] : memref<1x128xf32, #tpu.memory_space<vmem>>, vector<1x128xf32>
    %11 = vector.shape_cast %10 : vector<1x128xf32> to vector<1x1x128xf32>
    %12 = vector.broadcast %11 : vector<1x1x128xf32> to vector<2x8x128xf32>
    %13 = arith.mulf %9, %12 : vector<2x8x128xf32>
    %cst_9 = arith.constant dense<0.000000e+00> : vector<2x8xf32>
    %14 = vector.multi_reduction <add>, %13, %cst_9 [2] : vector<2x8x128xf32> to vector<2x8xf32>
    %cst_10 = arith.constant dense<0xFF800000> : vector<2xf32>
    %15 = vector.multi_reduction <maximumf>, %14, %cst_10 [1] : vector<2x8xf32> to vector<2xf32>
    %16 = vector.shape_cast %15 : vector<2xf32> to vector<2x1xf32>
    %17 = vector.broadcast %16 : vector<2x1xf32> to vector<2x8xf32>
    %18 = arith.subf %14, %17 : vector<2x8xf32>
    %19 = math.exp %18 : vector<2x8xf32>
    %cst_11 = arith.constant dense<0.000000e+00> : vector<2xf32>
    %20 = vector.multi_reduction <add>, %19, %cst_11 [1] : vector<2x8xf32> to vector<2xf32>
    %21 = vector.shape_cast %20 : vector<2xf32> to vector<2x1xf32>
    %22 = vector.shape_cast %19 : vector<2x8xf32> to vector<2x8x1xf32>
    %23 = vector.broadcast %22 : vector<2x8x1xf32> to vector<2x8x32xf32>
    %24 = arith.mulf %0, %23 : vector<2x8x32xf32>
    %cst_12 = arith.constant dense<0.000000e+00> : vector<2x32xf32>
    %25 = vector.multi_reduction <add>, %24, %cst_12 [1] : vector<2x8x32xf32> to vector<2x32xf32>
    %26 = vector.broadcast %21 : vector<2x1xf32> to vector<2x32xf32>
    %27 = arith.divf %25, %26 : vector<2x32xf32>
    %c0_13 = arith.constant 0 : index
    %c0_14 = arith.constant 0 : index
    %28 = vector.load %arg5[%c0_13, %c0_14] : memref<2x32xf32, #tpu.memory_space<vmem>>, vector<2x32xf32>
    tpu.vector_store %arg5[%c0_13, %c0_14], %27 {strides = array<i32>} : memref<2x32xf32, #tpu.memory_space<vmem>>, vector<2x32xf32>,
    return
  }
  func.func @transform_0(%arg0: i32) -> (i32, i32, i32) {
    %c0_i32 = arith.constant 0 : i32
    %c0_i32_0 = arith.constant 0 : i32
    %c0_i32_1 = arith.constant 0 : i32
    return %arg0, %c0_i32, %c0_i32_0 : i32, i32, i32
  }
  func.func @transform_1(%arg0: i32) -> (i32, i32) {
    %c0_i32 = arith.constant 0 : i32
    %c0_i32_0 = arith.constant 0 : i32
    %c0_i32_1 = arith.constant 0 : i32
    return %c0_i32, %c0_i32_0 : i32, i32
  }
  func.func @transform_2(%arg0: i32) -> (i32, i32) {
    %c0_i32 = arith.constant 0 : i32
    %c0_i32_0 = arith.constant 0 : i32
    %c0_i32_1 = arith.constant 0 : i32
    return %c0_i32, %c0_i32_0 : i32, i32
  }
  func.func @transform_3(%arg0: i32) -> (i32, i32) {
    %c0_i32 = arith.constant 0 : i32
    %c0_i32_0 = arith.constant 0 : i32
    %c0_i32_1 = arith.constant 0 : i32
    return %c0_i32, %c0_i32_0 : i32, i32
  }
  func.func @transform_4(%arg0: i32) -> (i32, i32) {
    %c0_i32 = arith.constant 0 : i32
    %c0_i32_0 = arith.constant 0 : i32
    return %arg0, %c0_i32 : i32, i32
  }
}

</mosaic_0001>

<bundles_post_ra>
// kernel: tpu_custom_call.1
= control target key start
LH: loop header
LB: loop body
LE: loop exit
PB: predicated region body
PF: predicated region fallthrough
CT: control target
= control target key end

     0   :  { %9 = vsyncpa [#allocation3], 0  ;;  %s1012_s0 = inlined_call_operand.hbm [shape: f32[2,8,32], index: 0, kind: input, shape index: {}]   ;;  %s1013_s1 = inlined_call_operand.hbm [shape: f32[32,128], index: 1, kind: input, shape index: {}]   ;;  %s1014_s2 = inlined_call_operand.vmem [shape: f32[1,128], index: 2, kind: input, shape index: {}]   ;;  %s1015_s3 = inlined_call_operand.vmem [shape: f32[1,128], index: 3, kind: input, shape index: {}]   ;;  %s1016_s4 = inlined_call_operand.hbm [shape: f32[2,32], index: 4, kind: output, shape index: {}]  }
   0x1   :  { %10 = vsyncpa [#allocation6], 0 }
   0x2   :  { %11 = vsyncpa [#allocation4], 0  ;;  %s901_s15 = smov [#allocation2]  }
   0x3   :  { %s17_s16 = sshll.u32 %s901_s15, 4  ;;  %s18_s16 = int_to_ptr.vmem [resolvable:$true] %s17_s16 }
   0x4   :  { %s843_s17 = scalar_lea.vmem %s18_s16, 256  ;;  %p848_p1 = scmp.lt.s32.totalorder %s18_s16, %s18_s16 }
   0x5   :  { %p844_p0 = scmp.ne.s32.totalorder %s18_s16, %s843_s17  ;;  %p849_p2 = scmp.lt.s32.totalorder %s843_s17, %s843_s17 }
   0x7   :  { %p850_p3 = por %p849_p2, %p848_p1 }
   0x9   :  { %p851_p4 = pnand %p850_p3, %p844_p0 }
   0xb   :  { %854 = shalt.err (!%p851_p4)
}
   0xc   :  { %s902_s18 = smov 128   ;;  %s903_s19 = smov 8  }
   0xd   :  { %23 = dma.hbm_to_vmem [thread:$0]  %s1012_s0, 256, %s18_s16, [#allocation3], %s902_s18, %s902_s18, %s903_s19  }
   0xe   :  { %s904_s22 = smov [#allocation5]  }
   0xf   :  { %s29_s23 = sshll.u32 %s904_s22, 4  ;;  %s30_s23 = int_to_ptr.vmem [resolvable:$true] %s29_s23 }
  0x10   :  { %s863_s24 = scalar_lea.vmem %s30_s23, 512  ;;  %p868_p6 = scmp.lt.s32.totalorder %s30_s23, %s30_s23 }
  0x11   :  { %p864_p5 = scmp.ne.s32.totalorder %s30_s23, %s863_s24  ;;  %p869_p7 = scmp.lt.s32.totalorder %s863_s24, %s863_s24 }
  0x13   :  { %p870_p8 = por %p869_p7, %p868_p6 }
  0x15   :  { %p871_p9 = pnand %p870_p8, %p864_p5 }
  0x17   :  { %874 = shalt.err (!%p871_p9)
}
  0x18   :  { %35 = dma.hbm_to_vmem [thread:$0]  %s1013_s1, 512, %s30_s23, [#allocation6], %s902_s18, %s902_s18, %s903_s19  }
  0x19   :  { %895 = dma.done.wait [#allocation3], 256  }
  0x1a   :  { %896 = vsyncadd [#allocation3], 4294967040 }
  0x1b   :  { %897 = dma.done.wait [#allocation6], 512  }
  0x1c   :  { %898 = vsyncadd [#allocation6], 4294966784  ;;  %vm59_vm0 = vcmask 261120   ;;  %v51_v0 = vld [vmem:[#allocation5 + $0x18] sm:$0xff]  ;;  %v50_v1 = vld [vmem:[#allocation5 + $0x10] sm:$0xff]  ;;  %vm621_vm1 = vcmask 1041409  }
  0x1d   :  { %v49_v2 = vld [vmem:[#allocation5 + $0x8] sm:$0xff]  ;;  %v938_v3 = vand.u32 4294901760, %v51_v0  ;;  %v940_v4 = vand.u32 4294901760, %v50_v1  ;;  %v48_v6 = vld [vmem:[#allocation5] sm:$0xff]  ;;  %v944_v7 = vld [vmem:[#allocation2] sm:$0xff]  ;;  %vm624_vm2 = vcmask 58368  }
  0x1e   :  { %v942_v5 = vand.u32 4294901760, %v49_v2  ;;  %v946_v8 = vld [vmem:[#allocation2 + $0x8] sm:$0xff]  ;;  %v948_v9 = vand.u32 4294901760, %v48_v6  ;;  %v61_v10 = vsel %vm59_vm0, %v944_v7, 0  ;;  %v715_v39 = vld [vmem:[%s1014_s2] ss:$0 sm:$0xff] }
  0x1f   :  { %v64_v11 = vsel %vm59_vm0, %v946_v8, 0  ;;  %753 = vmatprep.subr.mxu0 %v938_v3  ;;  %v181_v12 = vsub.f32 %v51_v0, %v938_v3  ;;  %v956_v13 = vand.u32 4294901760, %v61_v10  ;;  %v188_v14 = vsub.f32 %v50_v1, %v940_v4  ;;  %v716_v0 = vld [vmem:[%s1015_s3] ss:$0 sm:$0xff]  ;;  %s906_s3 = smov [#allocation7]  }
  0x20   :  { %v959_v15 = vand.u32 4294901760, %v64_v11  ;;  %754 = vmatpush3.msra.mxu0 %v938_v3  ;;  %v195_v16 = vsub.f32 %v49_v2, %v942_v5  ;;  %v202_v17 = vsub.f32 %v48_v6, %v948_v9  ;;  %s705_s28 = sshll.u32 %s906_s3, 4  ;;  %vm697_vm3 = vcmask 254976   ;;  %s706_s28 = int_to_ptr.vmem [resolvable:$true] %s705_s28 }
  0x21   :  { %755 = vmatprep.subr.mxu0 %v940_v4  ;;  %v182_v18 = vand.u32 4294901760, %v181_v12  ;;  %v136_v19 = vsub.f32 %v61_v10, %v956_v13  ;;  %v189_v20 = vand.u32 4294901760, %v188_v14  ;;  %772 = vmatprep.mubr.f32.mxu1 %v956_v13  ;;  %s875_s29 = scalar_lea.vmem %s706_s28, 32  ;;  %p880_p11 = scmp.lt.s32.totalorder %s706_s28, %s706_s28 }
  0x22   :  { %v146_v21 = vsub.f32 %v64_v11, %v959_v15  ;;  %756 = vmatpush3.msra.mxu0 %v940_v4  ;;  %v196_v22 = vand.u32 4294901760, %v195_v16  ;;  %v203_v23 = vand.u32 4294901760, %v202_v17  ;;  %p876_p10 = scmp.ne.s32.totalorder %s706_s28, %s875_s29  ;;  %p881_p12 = scmp.lt.s32.totalorder %s875_s29, %s875_s29 }
  0x23   :  { %757 = vmatprep.subr.mxu0 %v942_v5  ;;  %v183_v24 = vsub.f32 %v181_v12, %v182_v18  ;;  %v137_v25 = vand.u32 4294901760, %v136_v19  ;;  %v190_v26 = vsub.f32 %v188_v14, %v189_v20 }
  0x24   :  { %v147_v27 = vand.u32 4294901760, %v146_v21  ;;  %758 = vmatpush3.msra.mxu0 %v942_v5  ;;  %v197_v28 = vsub.f32 %v195_v16, %v196_v22  ;;  %v204_v29 = vsub.f32 %v202_v17, %v203_v23  ;;  %p882_p13 = por %p881_p12, %p880_p11 }
  0x25   :  { %759 = vmatprep.subr.mxu0 %v948_v9  ;;  %v184_v30 = vand.u32 4294901760, %v183_v24  ;;  %v138_v31 = vsub.f32 %v136_v19, %v137_v25  ;;  %v191_v32 = vand.u32 4294901760, %v190_v26 }
  0x26   :  { %v148_v33 = vsub.f32 %v146_v21, %v147_v27  ;;  %760 = vmatpush3.msra.mxu0 %v948_v9  ;;  %v198_v36 = vand.u32 4294901760, %v197_v28  ;;  %v205_v37 = vand.u32 4294901760, %v204_v29  ;;  %p883_p0 = pnand %p882_p13, %p876_p10 }
  0x27   :  { %764 = vmatprep.subr.mxu1 %v184_v30  ;;  %v139_v34 = vand.u32 4294901760, %v138_v31  ;;  %775 = vmatprep.subr.mxu0 %v181_v12 }
  0x28   :  { %v149_v35 = vand.u32 4294901760, %v148_v33  ;;  %765 = vmatpush3.msra.mxu1 %v184_v30 }
  0x29   :  { %761 = vmatprep.mubr.f32.mxu0 %v139_v34  ;;  %766 = vmatprep.subr.mxu1 %v191_v32 }
  0x2a   :  { %762 = vmatmul.mubr.f32.vlgmr.msra.gmra.mxu0 %v149_v35  ;;  %767 = vmatpush3.msra.mxu1 %v191_v32 }
  0x2b   :  { %776 = vmatpush3.msra.mxu0 %v181_v12  ;;  %768 = vmatprep.subr.mxu1 %v198_v36 }
  0x2c   :  { %777 = vmatprep.subr.mxu0 %v188_v14  ;;  %769 = vmatpush3.msra.mxu1 %v198_v36 }
  0x2d   :  { %778 = vmatpush3.msra.mxu0 %v188_v14  ;;  %770 = vmatprep.subr.mxu1 %v205_v37 }
  0x2e   :  { %779 = vmatprep.subr.mxu0 %v195_v16  ;;  %771 = vmatpush3.msra.mxu1 %v205_v37 }
  0x2f   :  { %780 = vmatpush3.msra.mxu0 %v195_v16  ;;  %773 = vmatmul.mubr.f32.vlgmr.msra.gmra.mxu1 %v959_v15  ;;  %v905_v16 = vmov 0  }
  0x30   :  { %781 = vmatprep.subr.mxu0 %v202_v17  ;;  %786 = vmatprep.subr.mxu1 %v938_v3 }
  0x31   :  { %782 = vmatpush3.msra.mxu0 %v202_v17  ;;  %783 = vmatprep.mubr.f32.mxu0 %v136_v19 }
  0x32   :  { %787 = vmatpush3.msra.mxu1 %v938_v3  ;;  %784 = vmatmul.mubr.f32.vlgmr.msra.gmra.mxu0 %v146_v21 }
  0x33   :  { %788 = vmatprep.subr.mxu1 %v940_v4  ;;  %797 = vmatprep.subr.mxu0 %v182_v18 }
  0x34   :  { %789 = vmatpush3.msra.mxu1 %v940_v4  ;;  %798 = vmatpush3.msra.mxu0 %v182_v18 }
  0x35   :  { %790 = vmatprep.subr.mxu1 %v942_v5  ;;  %799 = vmatprep.subr.mxu0 %v189_v20 }
  0x36   :  { %791 = vmatpush3.msra.mxu1 %v942_v5  ;;  %800 = vmatpush3.msra.mxu0 %v189_v20 }
  0x37   :  { %792 = vmatprep.subr.mxu1 %v948_v9  ;;  %801 = vmatprep.subr.mxu0 %v196_v22 }
  0x38   :  { %793 = vmatpush3.msra.mxu1 %v948_v9  ;;  %794 = vmatprep.mubr.f32.mxu1 %v137_v25 }
  0x39   :  { %802 = vmatpush3.msra.mxu0 %v196_v22  ;;  %795 = vmatmul.mubr.f32.vlgmr.msra.gmra.mxu1 %v147_v27 }
  0x3a   :  { %803 = vmatprep.subr.mxu0 %v203_v23  ;;  %808 = vmatprep.subr.mxu1 %v938_v3 }
  0x3b   :  { %804 = vmatpush3.msra.mxu0 %v203_v23  ;;  %805 = vmatprep.mubr.f32.mxu0 %v956_v13 }
  0x3c   :  { %809 = vmatpush3.msra.mxu1 %v938_v3  ;;  %806 = vmatmul.mubr.f32.vlgmr.msra.gmra.mxu0 %v959_v15 }
  0x3d   :  { %810 = vmatprep.subr.mxu1 %v940_v4  ;;  %816 = vmatprep.mubr.f32.mxu1 %v956_v13 }
  0x3e   :  { %811 = vmatpush3.msra.mxu1 %v940_v4  ;;  %v611_v4 = vlaneseq  ;;  %826 = vset.pattern.permute.xlu0 %v905_v16 }
  0x3f   :  { %812 = vmatprep.subr.mxu1 %v942_v5  ;;  %825 = vset.pattern.permute.xlu1 %v905_v16 }
  0x40   :  { %813 = vmatpush3.msra.mxu1 %v942_v5  ;;  %v612_v5 = vand.u32 127, %v611_v4  ;;  %v614_v6 = vshrl.u32 %v611_v4, 7 }
  0x41   :  { %814 = vmatprep.subr.mxu1 %v948_v9 }
  0x42   :  { %815 = vmatpush3.msra.mxu1 %v948_v9  ;;  %v615_v10 = vsub.s32 %v612_v5, %v614_v6  ;;  %v631_v17 = vsub.s32 0, %v614_v6  ;;  %v635_v18 = vsub.s32 1, %v614_v6 }
  0x43   :  { %817 = vmatmul.mubr.f32.vlgmr.msra.gmra.mxu1 %v959_v15 }
  0xea   :  { %v763_v38 = vpop.f32.mrf.mxu0 }
  0xeb   :  { %v152_v42 = vadd.f32 %v763_v38, %v715_v39 }
  0xec   :  { %v141_v40 = vpop.f32.mrf.mxu0 }
  0xed   :  { %v142_v43 = vadd.f32 %v715_v39, %v141_v40 }
  0xef   :  { %v774_v41 = vpop.f32.mrf.mxu1 }
  0xf0   :  { %v249_v47 = vadd.f32 %v774_v41, %v152_v42 }
  0xf1   :  { %v242_v44 = vpop.f32.mrf.mxu1 }
  0xf2   :  { %v785_v45 = vpop.f32.mrf.mxu0  ;;  %v243_v48 = vadd.f32 %v242_v44, %v142_v43 }
  0xf3   :  { %v336_v52 = vadd.f32 %v785_v45, %v249_v47 }
  0xf4   :  { %v328_v49 = vpop.f32.mrf.mxu0 }
  0xf5   :  { %v329_v53 = vadd.f32 %v328_v49, %v243_v48 }
  0xf9   :  { %v796_v46 = vpop.f32.mrf.mxu1 }
  0xfa   :  { %v421_v54 = vadd.f32 %v796_v46, %v336_v52 }
  0xfb   :  { %v412_v50 = vpop.f32.mrf.mxu1 }
  0xfc   :  { %v807_v51 = vpop.f32.mrf.mxu0  ;;  %v413_v55 = vadd.f32 %v412_v50, %v329_v53 }
  0xfd   :  { %v510_v58 = vadd.f32 %v807_v51, %v421_v54 }
  0xfe   :  { %v503_v56 = vpop.f32.mrf.mxu0 }
  0xff   :  { %v504_v59 = vadd.f32 %v503_v56, %v413_v55 }
 0x103   :  { %v818_v57 = vpop.f32.mrf.mxu1 }
 0x104   :  { %v591_v61 = vadd.f32 %v818_v57, %v510_v58 }
 0x105   :  { %v584_v60 = vpop.f32.mrf.mxu1 }
 0x106   :  { %v585_v62 = vadd.f32 %v584_v60, %v504_v59  ;;  %v595_v1 = vmax.f32 %v591_v61, 0.0 }
 0x108   :  { %v594_v63 = vmax.f32 %v585_v62, 0.0  ;;  %v604_v3 = vmul.f32 %v716_v0, %v595_v1 }
 0x10a   :  { %v603_v2 = vmul.f32 %v716_v0, %v594_v63 }
 0x10c   :  { %605 = vadd.xlane.f32.xlu0 %v603_v2 }
 0x110   :  { %607 = vadd.xlane.f32.xlu0 %v604_v3 }
 0x195   :  { %v606_v9 = vpop.xlane.xlu0 %605 }
 0x196   :  { %v616_v12 = vrot.slane %v606_v9, %v615_v10 }
 0x199   :  { %v608_v11 = vpop.xlane.xlu0 %607 }
 0x19a   :  { %v620_v13 = vrot.slane %v608_v11, %v615_v10 }
 0x19c   :  { %v622_v14 = vsel %vm621_vm1, %v620_v13, %v616_v12 }
 0x19d   :  { %v625_v15 = vsel %vm624_vm2, %v622_v14, -inf }
 0x19e   :  { %626 = vmax.xlane.f32.xlu1 %v625_v15 }
 0x227   :  { %v627_v19 = vpop.xlane.xlu1 %626 }
 0x228   :  { %v632_v20 = vrot.slane %v627_v19, %v631_v17  ;;  %v636_v21 = vrot.slane %v627_v19, %v635_v18 }
 0x22a   :  { %v639_v22 = vsub.f32 %v606_v9, %v632_v20  ;;  %v640_v23 = vsub.f32 %v608_v11, %v636_v21 }
 0x22c   :  { %v641_v24 = vmul.f32 1.442695, %v639_v22  ;;  %v643_v25 = vmul.f32 1.442695, %v640_v23 }
 0x22e   :  { %827 = vpow2.f32 %v641_v24 }
 0x22f   :  { %829 = vpow2.f32 %v643_v25 }
 0x23b   :  { %v828_v26 = vpop.eup %827 }
 0x23c   :  { %v830_v27 = vpop.eup %829  ;;  %648 = vperm.xlu1 %825, %v828_v26  }
 0x23d   :  { %651 = vperm.xlu0 %826, %v830_v27  }
 0x2b7   :  { %v649_v28 = vpop.permute.xlu1 %648 }
 0x2b8   :  { %v652_v29 = vpop.permute.xlu0 %651  ;;  %v656_v30 = vrot.slane %v649_v28, %v615_v10  ;;  %v668_v35 = vmul.f32 %v649_v28, %v944_v7 }
 0x2b9   :  { %v660_v31 = vrot.slane %v652_v29, %v615_v10  ;;  %v669_v34 = vmul.f32 %v652_v29, %v946_v8 }
 0x2ba   :  { %v670_v37 = vsel %vm59_vm0, %v668_v35, 0.0 }
 0x2bb   :  { %v661_v32 = vsel %vm621_vm1, %v660_v31, %v656_v30  ;;  %v677_v36 = vsel %vm59_vm0, %v669_v34, 0.0  ;;  %v671_v39 = vrot.slane %v670_v37, 4 }
 0x2bc   :  { %v663_v33 = vsel %vm624_vm2, %v661_v32, 0.0  ;;  %v678_v38 = vrot.slane %v677_v36, 4 }
 0x2bd   :  { %664 = vadd.xlane.f32.xlu1 %v663_v33  ;;  %v672_v42 = vadd.f32 %v671_v39, %v670_v37 }
 0x2be   :  { %v679_v40 = vadd.f32 %v678_v38, %v677_v36 }
 0x2bf   :  { %v673_v45 = vrot.slane %v672_v42, 2 }
 0x2c0   :  { %v680_v44 = vrot.slane %v679_v40, 2 }
 0x2c1   :  { %v674_v47 = vadd.f32 %v673_v45, %v672_v42 }
 0x2c2   :  { %v681_v46 = vadd.f32 %v680_v44, %v679_v40 }
 0x2c3   :  { %v675_v8 = vrot.slane %v674_v47, 1 }
 0x2c4   :  { %v682_v48 = vrot.slane %v681_v46, 1 }
 0x2c5   :  { %v676_v51 = vadd.f32 %v675_v8, %v674_v47 }
 0x2c6   :  { %v683_v7 = vadd.f32 %v682_v48, %v681_v46 }
 0x346   :  { %v665_v41 = vpop.xlane.xlu1 %664 }
 0x347   :  { %v685_v43 = vrot.slane %v665_v41, 1  ;;  %831 = vrcp.f32 %v665_v41 }
 0x349   :  { %833 = vrcp.f32 %v685_v43 }
 0x354   :  { %v832_v49 = vpop.eup %831 }
 0x355   :  { %v689_v53 = vmul.f32 %v832_v49, %v676_v51 }
 0x356   :  { %v834_v50 = vpop.eup %833 }
 0x357   :  { %v691_v52 = vmul.f32 %v834_v50, %v683_v7 }
 0x359   :  { %v694_v54 = vrot.slane %v691_v52, 7 }
 0x35b   :  { %v695_v55 = vsel %vm621_vm1, %v694_v54, %v689_v53 }
 0x35c   :  { %698 = vst.msk [vmem:[#allocation7] sm:$0x3] %vm697_vm3, %v695_v55 }
 0x35d   :  { %886 = shalt.err (!%p883_p0)
}
 0x35e   :  { %708 = dma.vmem_to_hbm [thread:$0]  %s706_s28, 32, %s1016_s4, [#allocation4]  }
 0x35f   :  { %899 = dma.done.wait [#allocation4], 32  }
 0x360   :  { %900 = vsyncadd [#allocation4], 4294967264 }
 0x361   :  { %712 = vsyncpa [#allocation3], 1 }
 0x362   :  { %713 = vsyncpa [#allocation6], 1 }
 0x363   :  { %714 = vsyncpa [#allocation4], 1 }

</bundles_post_ra>
